<compile_context>
chip_gen: v6e
topology: v6e:2x2x1
jax: 0.10.0
libtpu: 0.0.40
codegen_flags: <defaults>
</compile_context>

<pallas_src>
import jax
import jax.numpy as jnp
from jax import lax
from jax.experimental import pallas as pl
from jax.experimental.pallas import tpu as pltpu

NUM_INPUTS = 4      # CartPole-v0 observation dim
NUM_ACTIONS = 2     # CartPole-v0 action dim
HIDDEN = 64
PACK = 128          # lane-dense packed output width (value lane 0, policy lanes 1..2)


def actor_critic_kernel(x_ref, w_sh_ref, b_sh_ref,
                        w_h1_ref, b_h1_ref, w_h2_ref, b_h2_ref,
                        out_ref):
    x = x_ref[...]                       # (TB, 4)  f32
    w_sh = w_sh_ref[...]                 # (4, 64)  f32

    # shared layer: K = 4, so use 4 VPU broadcast-FMAs instead of a padded MXU pass.
    base = (x[:, 0:1] * w_sh[0:1, :]
            + x[:, 1:2] * w_sh[1:2, :]
            + x[:, 2:3] * w_sh[2:3, :]
            + x[:, 3:4] * w_sh[3:4, :]
            + b_sh_ref[...])                                   # (TB, 64) f32
    base = jnp.maximum(base, 0.0).astype(jnp.bfloat16)

    # fused critic/actor hidden layer: columns 0..63 = critic, 64..127 = actor.
    h = jnp.dot(base, w_h1_ref[...],
                preferred_element_type=jnp.float32) + b_h1_ref[...]   # (TB, 128) f32

    # fused block-diagonal output layer -> lane-packed slab:
    #   lane 0 = value, lanes 1..2 = policy logits, lanes 3..127 = 0.
    out = jnp.dot(h.astype(jnp.bfloat16), w_h2_ref[...],
                  preferred_element_type=jnp.float32) + b_h2_ref[...]  # (TB, 128) f32

    # masked softmax over the action lanes only (f32 throughout).
    lane = lax.broadcasted_iota(jnp.int32, out.shape, dimension=1)
    amask = (lane >= 1) & (lane <= NUM_ACTIONS)
    logits = jnp.where(amask, out, -jnp.inf)
    m = jnp.max(logits, axis=1, keepdims=True)
    e = jnp.exp(logits - m)                                    # 0 on non-action lanes
    s = jnp.sum(e, axis=1, keepdims=True)
    probs = e * pl.reciprocal(s, approx=True)

    # lane-dense store: value in lane 0, probs in lanes 1..2, padding elsewhere.
    out_ref[...] = jnp.where(amask, probs, out)


def _batch_tile(batch):
    if batch >= 128:
        return 128
    return max(8, ((batch + 7) // 8) * 8)


def actor_critic_forward(state, fused):
    """state: (num_inputs,) or (B, num_inputs); fused: dict from fuse_params()."""
    state = jnp.asarray(state, jnp.float32)
    if state.ndim == 1:
        state = state[None, :]                      # mirrors torch .unsqueeze(0)
    B = state.shape[0]
    TB = _batch_tile(B)
    Bp = ((B + TB - 1) // TB) * TB
    if Bp != B:
        state = jnp.pad(state, ((0, Bp - B), (0, 0)))

    const = lambda i: (0, 0)                        # weights resident across batch tiles
    packed = pl.pallas_call(
        actor_critic_kernel,
        grid=(Bp // TB,),
        in_specs=[
            pl.BlockSpec((TB, NUM_INPUTS), lambda i: (i, 0)),
            pl.BlockSpec((NUM_INPUTS, HIDDEN), const),
            pl.BlockSpec((1, HIDDEN), const),
            pl.BlockSpec((HIDDEN, 2 * HIDDEN), const),
            pl.BlockSpec((1, 2 * HIDDEN), const),
            pl.BlockSpec((2 * HIDDEN, PACK), const),
            pl.BlockSpec((1, PACK), const),
        ],
        out_specs=pl.BlockSpec((TB, PACK), lambda i: (i, 0)),
        out_shape=jax.ShapeDtypeStruct((Bp, PACK), jnp.float32),
        compiler_params=pltpu.CompilerParams(dimension_semantics=("parallel",)),
    )(state, fused["w_sh"], fused["b_sh"],
      fused["w_h1"], fused["b_h1"], fused["w_h2"], fused["b_h2"])

    value = packed[:B, 0:1]                         # (B, 1)
    policy = packed[:B, 1:1 + NUM_ACTIONS]          # (B, num_actions)
    return value, policy


actor_critic_forward = jax.jit(actor_critic_forward)


def init_params(key):
    """Deterministic init mirroring nn.Linear's U(-1/sqrt(fan_in), 1/sqrt(fan_in))."""
    def linear(k, fan_in, fan_out):
        kw, kb = jax.random.split(k)
        bound = 1.0 / jnp.sqrt(float(fan_in))
        w = jax.random.uniform(kw, (fan_in, fan_out), jnp.float32, -bound, bound)
        b = jax.random.uniform(kb, (1, fan_out), jnp.float32, -bound, bound)
        return w, b

    k = jax.random.split(key, 5)
    w_sh, b_sh = linear(k[0], NUM_INPUTS, HIDDEN)
    w_c1, b_c1 = linear(k[1], HIDDEN, HIDDEN)
    w_c2, b_c2 = linear(k[2], HIDDEN, 1)
    w_a1, b_a1 = linear(k[3], HIDDEN, HIDDEN)
    w_a2, b_a2 = linear(k[4], HIDDEN, NUM_ACTIONS)
    return dict(w_sh=w_sh, b_sh=b_sh, w_c1=w_c1, b_c1=b_c1, w_c2=w_c2, b_c2=b_c2,
                w_a1=w_a1, b_a1=b_a1, w_a2=w_a2, b_a2=b_a2)


def fuse_params(p):
    """Host-side (one-time) fusion of the critic/actor heads into lane-dense slabs."""
    w_h1 = jnp.concatenate([p["w_c1"], p["w_a1"]], axis=1)          # (64, 128)
    b_h1 = jnp.concatenate([p["b_c1"], p["b_a1"]], axis=1)          # (1, 128)
    w_h2 = jnp.zeros((2 * HIDDEN, PACK), jnp.float32)               # block-diagonal (128, 128)
    w_h2 = w_h2.at[:HIDDEN, 0:1].set(p["w_c2"])
    w_h2 = w_h2.at[HIDDEN:, 1:1 + NUM_ACTIONS].set(p["w_a2"])
    b_h2 = jnp.zeros((1, PACK), jnp.float32)
    b_h2 = b_h2.at[:, 0:1].set(p["b_c2"])
    b_h2 = b_h2.at[:, 1:1 + NUM_ACTIONS].set(p["b_a2"])
    return dict(
        w_sh=p["w_sh"], b_sh=p["b_sh"],                             # f32 (VPU path)
        w_h1=w_h1.astype(jnp.bfloat16), b_h1=b_h1,                  # bf16 matmul, f32 bias
        w_h2=w_h2.astype(jnp.bfloat16), b_h2=b_h2,
    )


def reference_forward(state, p):
    """Pure-JAX f32 reference with exact PyTorch-forward semantics."""
    base = jnp.maximum(state @ p["w_sh"] + p["b_sh"], 0.0)
    value = (base @ p["w_c1"] + p["b_c1"]) @ p["w_c2"] + p["b_c2"]
    logits = (base @ p["w_a1"] + p["b_a1"]) @ p["w_a2"] + p["b_a2"]
    return value, jax.nn.softmax(logits, axis=1)


if __name__ == "__main__":
    key = jax.random.PRNGKey(0)
    pkey, skey = jax.random.split(key)
    raw_params = init_params(pkey)
    fused_params = fuse_params(raw_params)

    # small batch of CartPole observations
    B = 8
    states = jax.random.normal(skey, (B, NUM_INPUTS), jnp.float32)

    value, policy = actor_critic_forward(states, fused_params)
    value = jax.block_until_ready(value)
    policy = jax.block_until_ready(policy)

    # also exercise the single-observation path (mirrors the PyTorch unsqueeze(0))
    v1, p1 = actor_critic_forward(states[0], fused_params)
    v1 = jax.block_until_ready(v1)

    # sanity checks against the f32 reference (bf16 head matmuls + approx reciprocal
    # introduce ~1e-3-level differences, well inside 2e-2)
    v_ref, p_ref = reference_forward(states, raw_params)
    assert value.shape == (B, 1) and policy.shape == (B, NUM_ACTIONS)
    assert v1.shape == (1, 1) and p1.shape == (1, NUM_ACTIONS)
    assert jnp.allclose(value, v_ref, atol=2e-2, rtol=2e-2)
    assert jnp.allclose(policy, p_ref, atol=2e-2, rtol=2e-2)
    assert jnp.allclose(jnp.sum(policy, axis=1), 1.0, atol=1e-2)

    print("KERNEL_OK")
</pallas_src>

<mosaic_0001>
module attributes {stable_mosaic.version = 11 : i64} {
  func.func @actor_critic_kernel(%arg0: i32, %arg1: memref<8x4xf32, #tpu.memory_space<vmem>>, %arg2: memref<4x64xf32, #tpu.memory_space<vmem>>, %arg3: memref<1x64xf32, #tpu.memory_space<vmem>>, %arg4: memref<64x128xbf16, #tpu.memory_space<vmem>>, %arg5: memref<1x128xf32, #tpu.memory_space<vmem>>, %arg6: memref<128x128xbf16, #tpu.memory_space<vmem>>, %arg7: memref<1x128xf32, #tpu.memory_space<vmem>>, %arg8: memref<8x128xf32, #tpu.memory_space<vmem>>) attributes {dimension_semantics = [#tpu.dimension_semantics<parallel>], iteration_bounds = array<i64: 1>, scalar_prefetch = 0 : i64, scratch_operands = 0 : i64, tpu.core_type = #tpu.core_type<tc>, window_params = [{transform_indices = @transform_0, window_bounds = array<i64: 8, 4>}, {pipeline_mode = #tpu.pipeline_mode<synchronous>, transform_indices = @transform_1, window_bounds = array<i64: 4, 64>}, {pipeline_mode = #tpu.pipeline_mode<synchronous>, transform_indices = @transform_2, window_bounds = array<i64: 1, 64>}, {pipeline_mode = #tpu.pipeline_mode<synchronous>, transform_indices = @transform_3, window_bounds = array<i64: 64, 128>}, {pipeline_mode = #tpu.pipeline_mode<synchronous>, transform_indices = @transform_4, window_bounds = array<i64: 1, 128>}, {pipeline_mode = #tpu.pipeline_mode<synchronous>, transform_indices = @transform_5, window_bounds = array<i64: 128, 128>}, {pipeline_mode = #tpu.pipeline_mode<synchronous>, transform_indices = @transform_6, window_bounds = array<i64: 1, 128>}, {transform_indices = @transform_7, window_bounds = array<i64: 8, 128>}]} {
    %c0 = arith.constant 0 : index
    %c0_0 = arith.constant 0 : index
    %0 = vector.load %arg1[%c0, %c0_0] : memref<8x4xf32, #tpu.memory_space<vmem>>, vector<8x4xf32>
    %c0_1 = arith.constant 0 : index
    %c0_2 = arith.constant 0 : index
    %1 = vector.load %arg2[%c0_1, %c0_2] : memref<4x64xf32, #tpu.memory_space<vmem>>, vector<4x64xf32>
    %2 = vector.extract_strided_slice %0 {offsets = [0, 0], sizes = [8, 1], strides = [1, 1]} : vector<8x4xf32> to vector<8x1xf32>
    %3 = vector.extract_strided_slice %1 {offsets = [0, 0], sizes = [1, 64], strides = [1, 1]} : vector<4x64xf32> to vector<1x64xf32>
    %4 = vector.broadcast %2 : vector<8x1xf32> to vector<8x64xf32>
    %5 = vector.broadcast %3 : vector<1x64xf32> to vector<8x64xf32>
    %6 = arith.mulf %4, %5 : vector<8x64xf32>
    %7 = vector.extract_strided_slice %0 {offsets = [0, 1], sizes = [8, 1], strides = [1, 1]} : vector<8x4xf32> to vector<8x1xf32>
    %8 = vector.extract_strided_slice %1 {offsets = [1, 0], sizes = [1, 64], strides = [1, 1]} : vector<4x64xf32> to vector<1x64xf32>
    %9 = vector.broadcast %7 : vector<8x1xf32> to vector<8x64xf32>
    %10 = vector.broadcast %8 : vector<1x64xf32> to vector<8x64xf32>
    %11 = arith.mulf %9, %10 : vector<8x64xf32>
    %12 = arith.addf %6, %11 : vector<8x64xf32>
    %13 = vector.extract_strided_slice %0 {offsets = [0, 2], sizes = [8, 1], strides = [1, 1]} : vector<8x4xf32> to vector<8x1xf32>
    %14 = vector.extract_strided_slice %1 {offsets = [2, 0], sizes = [1, 64], strides = [1, 1]} : vector<4x64xf32> to vector<1x64xf32>
    %15 = vector.broadcast %13 : vector<8x1xf32> to vector<8x64xf32>
    %16 = vector.broadcast %14 : vector<1x64xf32> to vector<8x64xf32>
    %17 = arith.mulf %15, %16 : vector<8x64xf32>
    %18 = arith.addf %12, %17 : vector<8x64xf32>
    %19 = vector.extract_strided_slice %0 {offsets = [0, 3], sizes = [8, 1], strides = [1, 1]} : vector<8x4xf32> to vector<8x1xf32>
    %20 = vector.extract_strided_slice %1 {offsets = [3, 0], sizes = [1, 64], strides = [1, 1]} : vector<4x64xf32> to vector<1x64xf32>
    %21 = vector.broadcast %19 : vector<8x1xf32> to vector<8x64xf32>
    %22 = vector.broadcast %20 : vector<1x64xf32> to vector<8x64xf32>
    %23 = arith.mulf %21, %22 : vector<8x64xf32>
    %24 = arith.addf %18, %23 : vector<8x64xf32>
    %c0_3 = arith.constant 0 : index
    %c0_4 = arith.constant 0 : index
    %25 = vector.load %arg3[%c0_3, %c0_4] : memref<1x64xf32, #tpu.memory_space<vmem>>, vector<1x64xf32>
    %26 = vector.broadcast %25 : vector<1x64xf32> to vector<8x64xf32>
    %27 = arith.addf %24, %26 : vector<8x64xf32>
    %cst = arith.constant 0.000000e+00 : f32
    %28 = vector.broadcast %cst : f32 to vector<8x64xf32>
    %29 = arith.maximumf %27, %28 : vector<8x64xf32>
    %30 = arith.truncf %29 : vector<8x64xf32> to vector<8x64xbf16>
    %c0_5 = arith.constant 0 : index
    %c0_6 = arith.constant 0 : index
    %31 = vector.load %arg4[%c0_5, %c0_6] : memref<64x128xbf16, #tpu.memory_space<vmem>>, vector<64x128xbf16>
    %cst_7 = arith.constant dense<0.000000e+00> : vector<8x128xf32>
    %32 = tpu.matmul %30, %31, %cst_7 {dimension_numbers = #tpu.dot_dimension_numbers<[1], [0], [0], [1], [0, 0, 1, 1], [], []>} : vector<8x64xbf16>, vector<64x128xbf16>, vector<8x128xf32> -> vector<8x128xf32>
    %c0_8 = arith.constant 0 : index
    %c0_9 = arith.constant 0 : index
    %33 = vector.load %arg5[%c0_8, %c0_9] : memref<1x128xf32, #tpu.memory_space<vmem>>, vector<1x128xf32>
    %34 = vector.broadcast %33 : vector<1x128xf32> to vector<8x128xf32>
    %35 = arith.addf %32, %34 : vector<8x128xf32>
    %36 = arith.truncf %35 : vector<8x128xf32> to vector<8x128xbf16>
    %c0_10 = arith.constant 0 : index
    %c0_11 = arith.constant 0 : index
    %37 = vector.load %arg6[%c0_10, %c0_11] : memref<128x128xbf16, #tpu.memory_space<vmem>>, vector<128x128xbf16>
    %cst_12 = arith.constant dense<0.000000e+00> : vector<8x128xf32>
    %38 = tpu.matmul %36, %37, %cst_12 {dimension_numbers = #tpu.dot_dimension_numbers<[1], [0], [0], [1], [0, 0, 1, 1], [], []>} : vector<8x128xbf16>, vector<128x128xbf16>, vector<8x128xf32> -> vector<8x128xf32>
    %c0_13 = arith.constant 0 : index
    %c0_14 = arith.constant 0 : index
    %39 = vector.load %arg7[%c0_13, %c0_14] : memref<1x128xf32, #tpu.memory_space<vmem>>, vector<1x128xf32>
    %40 = vector.broadcast %39 : vector<1x128xf32> to vector<8x128xf32>
    %41 = arith.addf %38, %40 : vector<8x128xf32>
    %42 = tpu.iota {dimensions = array<i32: 1>} : vector<8x128xi32>
    %c1_i32 = arith.constant 1 : i32
    %43 = vector.broadcast %c1_i32 : i32 to vector<8x128xi32>
    %44 = arith.cmpi sge, %42, %43 : vector<8x128xi32>
    %c2_i32 = arith.constant 2 : i32
    %45 = vector.broadcast %c2_i32 : i32 to vector<8x128xi32>
    %46 = arith.cmpi sle, %42, %45 : vector<8x128xi32>
    %47 = arith.andi %44, %46 : vector<8x128xi1>
    %cst_15 = arith.constant 0xFF800000 : f32
    %48 = vector.broadcast %cst_15 : f32 to vector<8x128xf32>
    %49 = arith.select %47, %41, %48 : vector<8x128xi1>, vector<8x128xf32>
    %cst_16 = arith.constant dense<0xFF800000> : vector<8xf32>
    %50 = vector.multi_reduction <maximumf>, %49, %cst_16 [1] : vector<8x128xf32> to vector<8xf32>
    %51 = vector.shape_cast %50 : vector<8xf32> to vector<8x1xf32>
    %52 = vector.broadcast %51 : vector<8x1xf32> to vector<8x128xf32>
    %53 = arith.subf %49, %52 : vector<8x128xf32>
    %54 = math.exp %53 : vector<8x128xf32>
    %cst_17 = arith.constant dense<0.000000e+00> : vector<8xf32>
    %55 = vector.multi_reduction <add>, %54, %cst_17 [1] : vector<8x128xf32> to vector<8xf32>
    %56 = vector.shape_cast %55 : vector<8xf32> to vector<8x1xf32>
    %57 = tpu.reciprocal %56 {approx = true} : vector<8x1xf32> -> vector<8x1xf32>
    %58 = vector.broadcast %57 : vector<8x1xf32> to vector<8x128xf32>
    %59 = arith.mulf %54, %58 : vector<8x128xf32>
    %60 = arith.select %47, %59, %41 : vector<8x128xi1>, vector<8x128xf32>
    %c0_18 = arith.constant 0 : index
    %c0_19 = arith.constant 0 : index
    %61 = vector.load %arg8[%c0_18, %c0_19] : memref<8x128xf32, #tpu.memory_space<vmem>>, vector<8x128xf32>
    tpu.vector_store %arg8[%c0_18, %c0_19], %60 {strides = array<i32>} : memref<8x128xf32, #tpu.memory_space<vmem>>, vector<8x128xf32>,
    return
  }
  func.func @transform_0(%arg0: i32) -> (i32, i32) {
    %c0_i32 = arith.constant 0 : i32
    %c0_i32_0 = arith.constant 0 : i32
    return %arg0, %c0_i32 : i32, i32
  }
  func.func @transform_1(%arg0: i32) -> (i32, i32) {
    %c0_i32 = arith.constant 0 : i32
    %c0_i32_0 = arith.constant 0 : i32
    %c0_i32_1 = arith.constant 0 : i32
    return %c0_i32, %c0_i32_0 : i32, i32
  }
  func.func @transform_2(%arg0: i32) -> (i32, i32) {
    %c0_i32 = arith.constant 0 : i32
    %c0_i32_0 = arith.constant 0 : i32
    %c0_i32_1 = arith.constant 0 : i32
    return %c0_i32, %c0_i32_0 : i32, i32
  }
  func.func @transform_3(%arg0: i32) -> (i32, i32) {
    %c0_i32 = arith.constant 0 : i32
    %c0_i32_0 = arith.constant 0 : i32
    %c0_i32_1 = arith.constant 0 : i32
    return %c0_i32, %c0_i32_0 : i32, i32
  }
  func.func @transform_4(%arg0: i32) -> (i32, i32) {
    %c0_i32 = arith.constant 0 : i32
    %c0_i32_0 = arith.constant 0 : i32
    %c0_i32_1 = arith.constant 0 : i32
    return %c0_i32, %c0_i32_0 : i32, i32
  }
  func.func @transform_5(%arg0: i32) -> (i32, i32) {
    %c0_i32 = arith.constant 0 : i32
    %c0_i32_0 = arith.constant 0 : i32
    %c0_i32_1 = arith.constant 0 : i32
    return %c0_i32, %c0_i32_0 : i32, i32
  }
  func.func @transform_6(%arg0: i32) -> (i32, i32) {
    %c0_i32 = arith.constant 0 : i32
    %c0_i32_0 = arith.constant 0 : i32
    %c0_i32_1 = arith.constant 0 : i32
    return %c0_i32, %c0_i32_0 : i32, i32
  }
  func.func @transform_7(%arg0: i32) -> (i32, i32) {
    %c0_i32 = arith.constant 0 : i32
    %c0_i32_0 = arith.constant 0 : i32
    return %arg0, %c0_i32 : i32, i32
  }
}

</mosaic_0001>

<bundles_post_ra>
// kernel: actor_critic_forward.1
= control target key start
LH: loop header
LB: loop body
LE: loop exit
PB: predicated region body
PF: predicated region fallthrough
CT: control target
= control target key end

     0   :  { %12 = vsyncpa [#allocation3], 0  ;;  %s544_s0 = inlined_call_operand.vmem [shape: f32[8,4], index: 0, kind: input, shape index: {}]   ;;  %s545_s1 = inlined_call_operand.vmem [shape: f32[4,64], index: 1, kind: input, shape index: {}]   ;;  %s546_s2 = inlined_call_operand.vmem [shape: f32[1,64], index: 2, kind: input, shape index: {}]   ;;  %s547_s3 = inlined_call_operand.hbm [shape: bf16[64,128], index: 3, kind: input, shape index: {}]   ;;  %s548_s4 = inlined_call_operand.vmem [shape: f32[1,128], index: 4, kind: input, shape index: {}]   ;;  %s549_s5 = inlined_call_operand.hbm [shape: bf16[128,128], index: 5, kind: input, shape index: {}]   ;;  %s550_s6 = inlined_call_operand.vmem [shape: f32[1,128], index: 6, kind: input, shape index: {}]   ;;  %s551_s7 = inlined_call_operand.vmem [shape: f32[8,128], index: 7, kind: output, shape index: {}]  }
   0x1   :  { %13 = vsyncpa [#allocation5], 0  ;;  %s462_s24 = smov [#allocation2]  }
   0x2   :  { %s25_s25 = sshll.u32 %s462_s24, 4  ;;  %s26_s25 = int_to_ptr.vmem [resolvable:$true] %s25_s25 }
   0x3   :  { %s426_s26 = scalar_lea.vmem %s26_s25, 512  ;;  %p431_p1 = scmp.lt.s32.totalorder %s26_s25, %s26_s25 }
   0x4   :  { %p427_p0 = scmp.ne.s32.totalorder %s26_s25, %s426_s26  ;;  %p432_p2 = scmp.lt.s32.totalorder %s426_s26, %s426_s26 }
   0x6   :  { %p433_p3 = por %p432_p2, %p431_p1 }
   0x8   :  { %p434_p4 = pnand %p433_p3, %p427_p0 }
   0xa   :  { %437 = shalt.err (!%p434_p4)
}
   0xb   :  { %s463_s27 = smov 64   ;;  %s464_s28 = smov 4  }
   0xc   :  { %31 = dma.hbm_to_vmem [thread:$0]  %s547_s3, 512, %s26_s25, [#allocation3], %s463_s27, %s463_s27, %s464_s28  }
   0xd   :  { %s465_s8 = smov [#allocation4]  }
   0xe   :  { %s39_s9 = sshll.u32 %s465_s8, 4  ;;  %s40_s9 = int_to_ptr.vmem [resolvable:$true] %s39_s9 }
   0xf   :  { %s446_s10 = scalar_lea.vmem %s40_s9, 1024  ;;  %p451_p6 = scmp.lt.s32.totalorder %s40_s9, %s40_s9 }
  0x10   :  { %p447_p5 = scmp.ne.s32.totalorder %s40_s9, %s446_s10  ;;  %p452_p7 = scmp.lt.s32.totalorder %s446_s10, %s446_s10 }
  0x12   :  { %p453_p8 = por %p452_p7, %p451_p6 }
  0x14   :  { %p454_p9 = pnand %p453_p8, %p447_p5 }
  0x16   :  { %457 = shalt.err (!%p454_p9)
}
  0x17   :  { %45 = dma.hbm_to_vmem [thread:$0]  %s549_s5, 1024, %s40_s9, [#allocation5], %s463_s27, %s463_s27, %s464_s28  }
  0x18   :  { %458 = dma.done.wait [#allocation3], 512  }
  0x19   :  { %459 = vsyncadd [#allocation3], 4294966784 }
  0x1a   :  { %460 = dma.done.wait [#allocation5], 1024  }
  0x1b   :  { %461 = vsyncadd [#allocation5], 4294966272  ;;  %v466_v0 = vmov 0   ;;  %v467_v1 = vmov 2   ;;  %v468_v2 = vmov 0.0   ;;  %v55_v3 = vld [vmem:[%s544_s0] sm:$0xff]  ;;  %v62_v17 = vlaneseq }
  0x1c   :  { %397 = vset.pattern.permute.xlu0 %v466_v0  ;;  %399 = vset.pattern.permute.xlu1 %v467_v1  ;;  %v402_v4 = vld [vmem:[#allocation2 + $0x18] sm:$0xff]   ;;  %v403_v5 = vld [vmem:[#allocation2 + $0x10] sm:$0xff]   ;;  %v469_v6 = vmov 1   ;;  %v470_v7 = vmov 3   ;;  %v404_v8 = vld [vmem:[#allocation2 + $0x8] sm:$0xff]   ;;  %vm471_vm0 = vmmov 0  }
  0x1d   :  { %355 = vmatprep.subr.bf16.mxu0 %v468_v2  ;;  %367 = vmatprep.subr.bf16.mxu1 %v468_v2  ;;  %v405_v9 = vld [vmem:[#allocation2] sm:$0xff]   ;;  %v406_v10 = vld [vmem:[#allocation4 + $0x38] sm:$0xff]   ;;  %v407_v11 = vld [vmem:[#allocation4 + $0x30] sm:$0xff]   ;;  %v63_v18 = vshrl.u32 %v62_v17, 7  ;;  %vm146_vm1 = vcmask 523264   ;;  %v303_v51 = vand.u32 127, %v62_v17 }
  0x1e   :  { %59 = vperm.xlu0 %397, %v55_v3   ;;  %78 = vperm.xlu1 %399, %v55_v3   ;;  %v408_v12 = vld [vmem:[#allocation4 + $0x28] sm:$0xff]   ;;  %v409_v13 = vld [vmem:[#allocation4 + $0x20] sm:$0xff]   ;;  %v410_v14 = vld [vmem:[#allocation4 + $0x18] sm:$0xff]  }
  0x1f   :  { %356 = vmatpush3.bf16.msra.mxu0 %v402_v4  ;;  %363 = vmatprep.mubr.msk.bf16.mxu0 %vm471_vm0, %v468_v2  ;;  %v411_v15 = vld [vmem:[#allocation4 + $0x10] sm:$0xff]   ;;  %v412_v16 = vld [vmem:[#allocation4 + $0x8] sm:$0xff]   ;;  %v64_v19 = vsub.s32 0, %v63_v18  ;;  %v73_v20 = vsub.s32 1, %v63_v18  ;;  %v56_v21 = vld [vmem:[%s545_s1] sm:$0xf] }
  0x20   :  { %357 = vmatprep.subr.bf16.mxu0 %v468_v2  ;;  %383 = vmatprep.mubr.msk.bf16.mxu1 %vm471_vm0, %v468_v2  ;;  %v83_v23 = vsub.s32 2, %v63_v18  ;;  %v93_v25 = vsub.s32 3, %v63_v18  ;;  %v325_v38 = vld [vmem:[%s546_s2] ss:$0 sm:$0xff]  ;;  %vm304_vm2 = vcmp.ge.s32.totalorder %v303_v51, 1  ;;  %vm305_vm3 = vcmp.le.s32.totalorder %v303_v51, 2 }
  0x21   :  { %368 = vmatpush3.bf16.msra.mxu1 %v406_v10  ;;  %v65_v26 = vrot.slane %v56_v21, %v64_v19  ;;  %v74_v27 = vrot.slane %v56_v21, %v73_v20  ;;  %v413_v43 = vld [vmem:[#allocation4] sm:$0xff]   ;;  %vm533_vm4 = vmand %vm304_vm2, %vm305_vm3 }
  0x22   :  { %398 = vset.pattern.permute.xlu0 %v469_v6  ;;  %400 = vset.pattern.permute.xlu1 %v470_v7  ;;  %v84_v28 = vrot.slane %v56_v21, %v83_v23  ;;  %v94_v29 = vrot.slane %v56_v21, %v93_v25  ;;  %v326_v44 = vld [vmem:[%s548_s4] ss:$0 sm:$0xff] }
  0x23   :  { %68 = vperm.xlu0 %398, %v55_v3   ;;  %88 = vperm.xlu1 %400, %v55_v3   ;;  %v332_v52 = vld [vmem:[%s550_s6] ss:$0 sm:$0xff] }
  0x24   :  { %358 = vmatpush3.bf16.msra.mxu0 %v403_v5  ;;  %369 = vmatprep.subr.bf16.mxu1 %v468_v2 }
  0x25   :  { %359 = vmatprep.subr.bf16.mxu0 %v468_v2  ;;  %370 = vmatpush3.bf16.msra.mxu1 %v407_v11 }
  0x26   :  { %371 = vmatprep.subr.bf16.mxu1 %v468_v2 }
  0x27   :  { %401 = vset.pattern.permute.xlu0 %v470_v7 }
  0x28   :  { %360 = vmatpush3.bf16.msra.mxu0 %v404_v8 }
  0x29   :  { %361 = vmatprep.subr.bf16.mxu0 %v468_v2  ;;  %372 = vmatpush3.bf16.msra.mxu1 %v408_v12 }
  0x2a   :  { %373 = vmatprep.subr.bf16.mxu1 %v468_v2 }
  0x2c   :  { %362 = vmatpush3.bf16.msra.mxu0 %v405_v9 }
  0x2d   :  { %374 = vmatpush3.bf16.msra.mxu1 %v409_v13 }
  0x2e   :  { %375 = vmatprep.subr.bf16.mxu1 %v468_v2 }
  0x31   :  { %376 = vmatpush3.bf16.msra.mxu1 %v410_v14 }
  0x32   :  { %377 = vmatprep.subr.bf16.mxu1 %v468_v2 }
  0x35   :  { %378 = vmatpush3.bf16.msra.mxu1 %v411_v15 }
  0x36   :  { %379 = vmatprep.subr.bf16.mxu1 %v468_v2 }
  0x39   :  { %380 = vmatpush3.bf16.msra.mxu1 %v412_v16 }
  0x3a   :  { %381 = vmatprep.subr.bf16.mxu1 %v468_v2 }
  0x3d   :  { %382 = vmatpush3.bf16.msra.mxu1 %v413_v43 }
  0x99   :  { %v60_v22 = vpop.permute.xlu0 %59  ;;  %v79_v24 = vpop.permute.xlu1 %78 }
  0x9a   :  { %v66_v32 = vmul.f32 %v65_v26, %v60_v22  ;;  %v85_v34 = vmul.f32 %v84_v28, %v79_v24 }
  0x9e   :  { %v69_v30 = vpop.permute.xlu0 %68  ;;  %v89_v31 = vpop.permute.xlu1 %88 }
  0x9f   :  { %v75_v33 = vmul.f32 %v74_v27, %v69_v30  ;;  %v95_v36 = vmul.f32 %v94_v29, %v89_v31 }
  0xa1   :  { %v76_v35 = vadd.f32 %v75_v33, %v66_v32 }
  0xa3   :  { %v86_v37 = vadd.f32 %v85_v34, %v76_v35 }
  0xa5   :  { %v96_v39 = vadd.f32 %v95_v36, %v86_v37 }
  0xa7   :  { %v104_v40 = vadd.f32 %v325_v38, %v96_v39 }
  0xa9   :  { %v105_v41 = vmax.f32 %v104_v40, 0.0 }
  0xab   :  { %v106_v42 = vpack.c.bf16 %v105_v41, %v105_v41 }
  0xad   :  { %364 = vmatmul.mubr.msk.bf16.vlgmr.msra.gmra.mxu0 %vm146_vm1, %v106_v42 }
 0x16d   :  { %v184_v45 = vpop.f32.mrf.mxu0 }
 0x16e   :  { %v185_v46 = vadd.f32 %v326_v44, %v184_v45 }
 0x16f   :  { %v365_v47 = vpop.f32.mrf.mxu0 }
 0x170   :  { %v190_v48 = vpack.c.bf16 %v185_v46, %v185_v46 }
 0x171   :  { %v187_v49 = vpop.f32.mrf.mxu0 }
 0x172   :  { %384 = vmatmul.mubr.bf16.vlgmr.msra.gmra.mxu1 %v190_v48 }
 0x173   :  { %v366_v50 = vpop.f32.mrf.mxu0 }
 0x232   :  { %v296_v53 = vpop.f32.mrf.mxu1 }
 0x233   :  { %v297_v55 = vadd.f32 %v332_v52, %v296_v53 }
 0x234   :  { %v385_v56 = vpop.f32.mrf.mxu1 }
 0x235   :  { %v307_v57 = vsel %vm533_vm4, %v297_v55, -inf }
 0x236   :  { %308 = vmax.xlane.f32.xlu1 %v307_v57  ;;  %v299_v58 = vpop.f32.mrf.mxu1 }
 0x238   :  { %v386_v59 = vpop.f32.mrf.mxu1 }
 0x2bf   :  { %v309_v60 = vpop.xlane.xlu1 %308 }
 0x2c0   :  { %v310_v61 = vsub.f32 %v307_v57, %v309_v60 }
 0x2c2   :  { %v311_v62 = vmul.f32 1.442695, %v310_v61 }
 0x2c4   :  { %414 = vpow2.f32 %v311_v62 }
 0x2d1   :  { %v415_v63 = vpop.eup %414 }
 0x2d2   :  { %313 = vadd.xlane.f32.xlu0 %v415_v63 }
 0x35b   :  { %v314_v0 = vpop.xlane.xlu0 %313 }
 0x35c   :  { %416 = vrcp.f32 %v314_v0 }
 0x369   :  { %v417_v1 = vpop.eup %416 }
 0x36a   :  { %v316_v2 = vmul.f32 %v417_v1, %v415_v63 }
 0x36c   :  { %v317_v3 = vsel %vm533_vm4, %v316_v2, %v297_v55 }
 0x36d   :  { %318 = vst [vmem:[%s551_s7] sm:$0xff] %v317_v3 }
 0x36e   :  { %323 = vsyncpa [#allocation3], 1 }
 0x36f   :  { %324 = vsyncpa [#allocation5], 1 }

</bundles_post_ra>
